<compile_context>
chip_gen: v6e
topology: v6e:2x2x1
jax: 0.10.0
libtpu: 0.0.40
codegen_flags: <defaults>
</compile_context>

<pallas_src>
import functools
import math

import jax
import jax.numpy as jnp
from jax.experimental import pallas as pl
from jax.experimental.pallas import tpu as pltpu


_WORKING_SET_BYTES = 12 << 20   # target for double-buffered blocks (all gens)
_VMEM_LIMIT_BYTES = 32 << 20    # explicit scoped-VMEM limit (safe v5e/v6e/v7x)


# ----------------------------------------------------------------------------
# Parameter setup (deterministic, mirrors PositionalEncoding.__init__)
# ----------------------------------------------------------------------------
def make_pe_table(max_positions: int, dim_embed: int) -> jnp.ndarray:
    assert dim_embed % 2 == 0
    position = jnp.arange(max_positions, dtype=jnp.float32)[:, None]      # (P, 1)
    dim_pair = jnp.arange(0, dim_embed, 2, dtype=jnp.float32)             # (D/2,)
    div_term = jnp.exp(dim_pair * (-math.log(10000.0) / dim_embed))       # (D/2,)
    ang = position * div_term                                             # (P, D/2)
    pe = jnp.zeros((max_positions, dim_embed), jnp.float32)
    pe = pe.at[:, 0::2].set(jnp.sin(ang))
    pe = pe.at[:, 1::2].set(jnp.cos(ang))
    return pe                                                             # (P, D)


# ----------------------------------------------------------------------------
# Pallas kernels
# ----------------------------------------------------------------------------
def _pe_add_kernel(x_ref, pe_ref, o_ref):
    # x_ref: (TB, TL), pe_ref: (1, TL) -> broadcast add over the batch rows.
    o_ref[...] = (x_ref[...] + pe_ref[...]).astype(o_ref.dtype)


def _pe_add_dropout_kernel(threshold, inv_keep, seed_ref, x_ref, pe_ref, o_ref):
    # threshold / inv_keep are Python compile-time literals (bound via partial).
    y = x_ref[...] + pe_ref[...]                       # (TB, TL), x.dtype
    tb, tl = y.shape
    # Global element coordinates of this block (deterministic per (seed, pos)).
    row = (jax.lax.broadcasted_iota(jnp.int32, (tb, tl), 0)
           + pl.program_id(1) * tb).astype(jnp.uint32)
    col = (jax.lax.broadcasted_iota(jnp.int32, (tb, tl), 1)
           + pl.program_id(0) * tl).astype(jnp.uint32)
    seed_u = seed_ref[0].astype(jnp.uint32)
    # Counter-based hash (murmur3 fmix32 flavour): portable jnp uint32 ops only,
    # so it lowers on Mosaic *and* in interpret mode (no pltpu.prng_* needed).
    h = (row * jnp.uint32(0x9E3779B1)) ^ (col * jnp.uint32(0x85EBCA77)) ^ seed_u
    h = h ^ (h >> 16)
    h = h * jnp.uint32(0x85EBCA6B)
    h = h ^ (h >> 13)
    h = h * jnp.uint32(0xC2B2AE35)
    h = h ^ (h >> 16)
    # uint32 threshold compare: P(drop) = threshold / 2^32 (exact, no sign hazard).
    keep = h >= jnp.uint32(threshold)
    # Keep the select/scale in x.dtype (no f32 promotion on bf16 paths).
    scale = jnp.asarray(inv_keep, dtype=y.dtype)
    zero = jnp.zeros((), dtype=y.dtype)
    o_ref[...] = jnp.where(keep, y * scale, zero).astype(o_ref.dtype)


# ----------------------------------------------------------------------------
# Tiling: (TB, TL) block of the flattened (B, S*D) view.
#   * TL (lane dim) is a multiple of 128 when it tiles, else the full dim.
#   * TB (sublane dim) is the full batch, or a multiple of the dtype's sublane
#     packing (8/16/32 for 4/2/1-byte dtypes).
#   * working set ~ 2x x + 2x out + 2x pe buffers kept under _WORKING_SET_BYTES.
# ----------------------------------------------------------------------------
def _choose_tiles(B: int, SD: int, itemsize: int):
    budget = _WORKING_SET_BYTES
    sub = {4: 8, 2: 16, 1: 32}.get(itemsize, 8)        # sublane packing per dtype
    TB0 = B if B <= sub else sub
    per_col = itemsize * (4 * TB0 + 2)                  # 2x(x,out) * TB0 rows + 2x pe
    tl_cap = max(128, budget // per_col)
    if SD <= tl_cap:
        TL = SD                                         # full lane dim (always legal)
    else:
        TL = (tl_cap // 128) * 128                      # lane-dense tiles, ragged edge ok
    # Grow the batch tile into whatever budget is left (helps small S*D, big B).
    tb_cap = max(TB0, (budget // (itemsize * TL) - 2) // 4)
    if tb_cap >= B:
        TB = B
    elif B <= sub:
        TB = B
    else:
        TB = max(TB0, (tb_cap // sub) * sub)            # aligned multiple of sublane pack
    return min(TB, B), TL


# ----------------------------------------------------------------------------
# Functional wrapper
# ----------------------------------------------------------------------------
def positional_encoding(x, pe_flat, *, drop_out: float = 0.1,
                        training: bool = False, seed: int = 0,
                        donate_x: bool = False):
    """x: (B, S, D); pe_flat: (1, max_positions*D) already in x.dtype."""
    B, S, D = x.shape
    SD = S * D
    PD = pe_flat.shape[-1]
    assert SD <= PD, "sequence length exceeds max_positions"
    assert pe_flat.dtype == x.dtype
    itemsize = jnp.dtype(x.dtype).itemsize

    if training and float(drop_out) >= 1.0:
        return jnp.zeros_like(x)                        # p == 1: everything dropped

    TB, TL = _choose_tiles(B, SD, itemsize)
    grid = (pl.cdiv(SD, TL), pl.cdiv(B, TB))            # lane-tile OUTER, batch INNER

    x2 = x.reshape(B, SD)                               # free view (contiguous)
    # pe stays the full cached flat table except in the rare case where the
    # lane block equals SD, SD is not 128-aligned, and the table is wider.
    if TL == SD and SD % 128 != 0 and SD != PD:
        pe_in = pe_flat[:, :SD]
    else:
        pe_in = pe_flat

    cost = pl.CostEstimate(
        flops=2 * B * SD, transcendentals=0,
        bytes_accessed=2 * B * SD * itemsize + SD * itemsize)
    cparams = pltpu.CompilerParams(
        dimension_semantics=("parallel", "parallel"),
        vmem_limit_bytes=_VMEM_LIMIT_BYTES)
    out_shape = jax.ShapeDtypeStruct((B, SD), x.dtype)

    if (not training) or drop_out == 0.0:
        # Eval-mode dropout is identity (PyTorch nn.Dropout in eval()).
        y2 = pl.pallas_call(
            _pe_add_kernel,
            out_shape=out_shape,
            grid_spec=pltpu.PrefetchScalarGridSpec(
                num_scalar_prefetch=0,
                grid=grid,
                in_specs=[
                    pl.BlockSpec((TB, TL), lambda l, b: (b, l)),
                    pl.BlockSpec((1, TL), lambda l, b: (0, l)),   # resident across b
                ],
                out_specs=pl.BlockSpec((TB, TL), lambda l, b: (b, l)),
            ),
            compiler_params=cparams,
            cost_estimate=cost,
            input_output_aliases=({0: 0} if donate_x else {}),
        )(x2, pe_in)
    else:
        p = float(drop_out)
        threshold = min(int(round(p * 2.0 ** 32)), 2 ** 32 - 1)   # P(drop)=thr/2^32
        inv_keep = 1.0 / (1.0 - p)
        # TODO(synk): dropout mask differs bit-for-bit from torch's RNG stream
        # (different generator); vary `seed` per training step or the mask repeats.
        seed_arr = jnp.asarray([seed], dtype=jnp.int32)
        kern = functools.partial(_pe_add_dropout_kernel, threshold, inv_keep)
        y2 = pl.pallas_call(
            kern,
            out_shape=out_shape,
            grid_spec=pltpu.PrefetchScalarGridSpec(
                num_scalar_prefetch=1,
                grid=grid,
                in_specs=[
                    pl.BlockSpec((TB, TL), lambda l, b, sref: (b, l)),
                    pl.BlockSpec((1, TL), lambda l, b, sref: (0, l)),
                ],
                out_specs=pl.BlockSpec((TB, TL), lambda l, b, sref: (b, l)),
            ),
            compiler_params=cparams,
            cost_estimate=cost,
            input_output_aliases=({1: 0} if donate_x else {}),    # x2 is input 1 here
        )(seed_arr, x2, pe_in)

    return y2.reshape(B, S, D)


# ----------------------------------------------------------------------------
# Module-style wrapper: precomputes + caches pe (flattened, per activation dtype)
# at init so the forward pass is a single Pallas launch (no per-call astype).
# ----------------------------------------------------------------------------
class PositionalEncoding:
    def __init__(self, max_positions: int, dim_embed: int, drop_out: float = 0.1):
        assert dim_embed % 2 == 0
        self.max_positions = max_positions
        self.dim_embed = dim_embed
        self.drop_out = float(drop_out)
        self.pe = make_pe_table(max_positions, dim_embed)          # (P, D) f32
        self._pe_flat_cache = {}

    def _pe_flat(self, dtype):
        key = jnp.dtype(dtype).name
        if key not in self._pe_flat_cache:
            self._pe_flat_cache[key] = jnp.asarray(
                self.pe.reshape(1, self.max_positions * self.dim_embed), dtype=dtype)
        return self._pe_flat_cache[key]

    def __call__(self, x, *, training: bool = False, seed: int = 0):
        return positional_encoding(x, self._pe_flat(x.dtype),
                                   drop_out=self.drop_out,
                                   training=training, seed=seed)


# ----------------------------------------------------------------------------
# Demo / self-check
# ----------------------------------------------------------------------------
if __name__ == "__main__":
    B, S, D = 2, 8, 32          # batch, seq, dim_embed
    MAX_POSITIONS = 16
    DROP = 0.1

    key = jax.random.PRNGKey(0)
    x = jax.random.normal(key, (B, S, D), dtype=jnp.float32)

    module = PositionalEncoding(MAX_POSITIONS, D, drop_out=DROP)
    ref = x + module.pe[None, :S, :]

    # Eval-mode (dropout = identity): exact match against the reference.
    y = module(x, training=False)
    y = jax.block_until_ready(y)
    assert y.shape == (B, S, D)
    assert jnp.allclose(y, ref, atol=1e-6), "eval-mode mismatch vs reference"

    # Training-mode (dropout active): surviving elements must equal ref/(1-p),
    # dropped elements are exactly 0, and the drop fraction is sane.
    y_train = module(x, training=True, seed=42)
    y_train = jax.block_until_ready(y_train)
    assert y_train.shape == (B, S, D)
    scale = 1.0 / (1.0 - DROP)
    nz = y_train != 0
    assert jnp.allclose(jnp.where(nz, y_train, 0.0),
                        jnp.where(nz, ref * scale, 0.0), atol=1e-5), \
        "training-mode surviving elements do not match ref * 1/(1-p)"
    frac_dropped = float(jnp.mean((~nz).astype(jnp.float32)))
    assert 0.0 < frac_dropped < 0.45, f"implausible drop fraction {frac_dropped}"

    print("KERNEL_OK")
</pallas_src>

<mosaic_0001>
module attributes {stable_mosaic.version = 11 : i64} {
  func.func @_pe_add_kernel(%arg0: i32, %arg1: i32, %arg2: memref<2x256xf32, #tpu.memory_space<vmem>>, %arg3: memref<1x256xf32, #tpu.memory_space<vmem>>, %arg4: memref<2x256xf32, #tpu.memory_space<vmem>>) attributes {dimension_semantics = [#tpu.dimension_semantics<parallel>, #tpu.dimension_semantics<parallel>], iteration_bounds = array<i64: 1, 1>, scalar_prefetch = 0 : i64, scratch_operands = 0 : i64, tpu.core_type = #tpu.core_type<tc>, window_params = [{transform_indices = @transform_0, window_bounds = array<i64: 2, 256>}, {transform_indices = @transform_1, window_bounds = array<i64: 1, 256>}, {transform_indices = @transform_2, window_bounds = array<i64: 2, 256>}]} {
    %c0 = arith.constant 0 : index
    %c0_0 = arith.constant 0 : index
    %0 = vector.load %arg2[%c0, %c0_0] : memref<2x256xf32, #tpu.memory_space<vmem>>, vector<2x256xf32>
    %c0_1 = arith.constant 0 : index
    %c0_2 = arith.constant 0 : index
    %1 = vector.load %arg3[%c0_1, %c0_2] : memref<1x256xf32, #tpu.memory_space<vmem>>, vector<1x256xf32>
    %2 = vector.broadcast %1 : vector<1x256xf32> to vector<2x256xf32>
    %3 = arith.addf %0, %2 : vector<2x256xf32>
    %c0_3 = arith.constant 0 : index
    %c0_4 = arith.constant 0 : index
    %4 = vector.load %arg4[%c0_3, %c0_4] : memref<2x256xf32, #tpu.memory_space<vmem>>, vector<2x256xf32>
    tpu.vector_store %arg4[%c0_3, %c0_4], %3 {strides = array<i32>} : memref<2x256xf32, #tpu.memory_space<vmem>>, vector<2x256xf32>,
    return
  }
  func.func @transform_0(%arg0: i32, %arg1: i32) -> (i32, i32) {
    %c0_i32 = arith.constant 0 : i32
    return %arg1, %arg0 : i32, i32
  }
  func.func @transform_1(%arg0: i32, %arg1: i32) -> (i32, i32) {
    %c0_i32 = arith.constant 0 : i32
    %c0_i32_0 = arith.constant 0 : i32
    return %c0_i32, %arg0 : i32, i32
  }
  func.func @transform_2(%arg0: i32, %arg1: i32) -> (i32, i32) {
    %c0_i32 = arith.constant 0 : i32
    return %arg1, %arg0 : i32, i32
  }
}

</mosaic_0001>

<bundles_post_ra>
// kernel: tpu_custom_call.1
= control target key start
LH: loop header
LB: loop body
LE: loop exit
PB: predicated region body
PF: predicated region fallthrough
CT: control target
= control target key end

     0   :  { %7 = vsyncpa [#allocation3], 0  ;;  %s172_s0 = inlined_call_operand.hbm [shape: f32[2,256], index: 0, kind: input, shape index: {}]   ;;  %s173_s1 = inlined_call_operand.hbm [shape: f32[1,512], index: 1, kind: input, shape index: {}]   ;;  %s174_s2 = inlined_call_operand.hbm [shape: f32[2,256], index: 2, kind: output, shape index: {}]  }
   0x1   :  { %8 = vsyncpa [#allocation6], 0 }
   0x2   :  { %9 = vsyncpa [#allocation4], 0  ;;  %s144_s9 = smov [#allocation2]   ;;  %s145_s11 = smov [#allocation5]  }
   0x3   :  { %s16_s10 = sshll.u32 %s144_s9, 4  ;;  %s26_s12 = sshll.u32 %s145_s11, 4  ;;  %s17_s10 = int_to_ptr.vmem [resolvable:$true] %s16_s10  ;;  %s27_s12 = int_to_ptr.vmem [resolvable:$true] %s26_s12 }
   0x4   :  { %s86_s13 = scalar_lea.vmem %s17_s10, 64  ;;  %p91_p1 = scmp.lt.s32.totalorder %s17_s10, %s17_s10 }
   0x5   :  { %p87_p0 = scmp.ne.s32.totalorder %s17_s10, %s86_s13  ;;  %p92_p2 = scmp.lt.s32.totalorder %s86_s13, %s86_s13 }
   0x7   :  { %p93_p3 = por %p92_p2, %p91_p1 }
   0x9   :  { %p94_p4 = pnand %p93_p3, %p87_p0 }
   0xb   :  { %97 = shalt.err (!%p94_p4)
}
   0xc   :  { %19 = dma.hbm_to_vmem [thread:$0]  %s172_s0, 64, %s17_s10, [#allocation3]  }
   0xd   :  { %s106_s16 = scalar_lea.vmem %s27_s12, 32  ;;  %p111_p6 = scmp.lt.s32.totalorder %s27_s12, %s27_s12 }
   0xe   :  { %p107_p5 = scmp.ne.s32.totalorder %s27_s12, %s106_s16  ;;  %p112_p7 = scmp.lt.s32.totalorder %s106_s16, %s106_s16 }
  0x10   :  { %p113_p8 = por %p112_p7, %p111_p6 }
  0x12   :  { %p114_p9 = pnand %p113_p8, %p107_p5 }
  0x14   :  { %117 = shalt.err (!%p114_p9)
}
  0x15   :  { %29 = dma.hbm_to_vmem [thread:$0]  %s173_s1, 32, %s27_s12, [#allocation6]  }
  0x16   :  { %138 = dma.done.wait [#allocation3], 64  }
  0x17   :  { %139 = vsyncadd [#allocation3], 4294967232 }
  0x18   :  { %140 = dma.done.wait [#allocation6], 32  }
  0x19   :  { %141 = vsyncadd [#allocation6], 4294967264  ;;  %v39_v0 = vlaneseq  ;;  %v146_v1 = vmov 1983009808   ;;  %v37_v7 = vld [vmem:[#allocation5] sm:$0x3] }
  0x1a   :  { %v49_v2 = vunpack.c.l.s4 %v146_v1  ;;  %v36_v12 = vld [vmem:[#allocation2] sm:$0xf]  ;;  %s147_s0 = smov [#allocation7]  }
  0x1b   :  { %v40_v3 = vshrl.u32 %v39_v0, 7  ;;  %s64_s19 = sshll.u32 %s147_s0, 4  ;;  %s65_s19 = int_to_ptr.vmem [resolvable:$true] %s64_s19 }
  0x1c   :  { %v50_v6 = vunpack.c.0.s8 %v49_v2  ;;  %s118_s1 = scalar_lea.vmem %s65_s19, 64  ;;  %p123_p11 = scmp.lt.s32.totalorder %s65_s19, %s65_s19 }
  0x1d   :  { %v41_v4 = vsub.s32 0, %v40_v3  ;;  %v45_v5 = vsub.s32 1, %v40_v3  ;;  %p119_p10 = scmp.ne.s32.totalorder %s65_s19, %s118_s1  ;;  %p124_p12 = scmp.lt.s32.totalorder %s118_s1, %s118_s1 }
  0x1e   :  { %v53_v10 = vsub.s32 %v50_v6, %v40_v3 }
  0x1f   :  { %v42_v8 = vrot.slane %v37_v7, %v41_v4  ;;  %v46_v9 = vrot.slane %v37_v7, %v45_v5  ;;  %p125_p13 = por %p124_p12, %p123_p11 }
  0x21   :  { %v47_v11 = vcombine.low %v42_v8, %v46_v9  ;;  %p126_p0 = pnand %p125_p13, %p119_p10 }
  0x23   :  { %v54_v13 = vrot.slane %v47_v11, %v53_v10 }
  0x25   :  { %v56_v14 = vadd.f32 %v54_v13, %v36_v12 }
  0x27   :  { %57 = vst [vmem:[#allocation7] sm:$0xf] %v56_v14 }
  0x28   :  { %129 = shalt.err (!%p126_p0)
}
  0x29   :  { %67 = dma.vmem_to_hbm [thread:$0]  %s65_s19, 64, %s174_s2, [#allocation4]  }
  0x2a   :  { %142 = dma.done.wait [#allocation4], 64  }
  0x2b   :  { %143 = vsyncadd [#allocation4], 4294967232 }
  0x2c   :  { %71 = vsyncpa [#allocation3], 1 }
  0x2d   :  { %72 = vsyncpa [#allocation6], 1 }
  0x2e   :  { %73 = vsyncpa [#allocation4], 1 }

</bundles_post_ra>
